<compile_context>
chip_gen: v7x
topology: tpu7x:2x2x1
jax: 0.10.0
libtpu: 0.0.40
codegen_flags: <defaults>
</compile_context>

<pallas_src>
import functools

import jax
import jax.numpy as jnp
from jax.experimental import pallas as pl
from jax.experimental.pallas import tpu as pltpu

_VMEM_LIMIT = 32 * 1024 * 1024     # scoped-VMEM limit safe on v5e/v6e/v7x
_VMEM_BUDGET = 20 * 1024 * 1024    # what we plan to actually occupy


def _stencil(x, do_normalize):
    """x: (..., R, W) value -> (..., R-2, W-2) Laplacian map (math in f32)."""
    c = x[..., 1:-1, 1:-1].astype(jnp.float32)
    s = (x[..., :-2, 1:-1].astype(jnp.float32)
         + x[..., 2:, 1:-1].astype(jnp.float32)
         + x[..., 1:-1, :-2].astype(jnp.float32)
         + x[..., 1:-1, 2:].astype(jnp.float32))
    c4 = 4.0 * c
    nom = jnp.abs(c4 - s)
    return nom / (c4 + s) if do_normalize else nom


# ---------------------------------------------------------------------------
# Path A: whole images per block, grid over the image axis only.
# ---------------------------------------------------------------------------
def _whole_image_kernel(x_ref, o_ref, *, do_normalize):
    # Single dense store of the final (TN, H-2, W-2) tile; no zero-fill,
    # no wrapper-side column slice afterwards.
    o_ref[...] = _stencil(x_ref[...], do_normalize).astype(o_ref.dtype)


def _pick_tn(n, h, w, itemsize):
    """Images per grid block.  Budgets the double-buffered in/out HBM-facing
    blocks plus ~4 block-sized transient f32 temporaries, and caps TN so the
    grid has >= min(n, 4) steps (keeps both v7x cores busy + pipelining)."""
    in_b = h * w * itemsize
    out_b = (h - 2) * (w - 2) * itemsize
    temps = 4 * (h - 2) * (w - 2) * 4
    per_image = 2 * (in_b + out_b) + temps
    fit = _VMEM_BUDGET // max(per_image, 1)
    if fit < 1:
        return 0                      # whole image does not fit -> H tiling
    return max(1, min(n, fit, pl.cdiv(n, 4)))


def _laplacian_whole(x_nhw, do_normalize, tn):
    n, h, w = x_nhw.shape
    kernel = functools.partial(_whole_image_kernel, do_normalize=do_normalize)
    return pl.pallas_call(
        kernel,
        out_shape=jax.ShapeDtypeStruct((n, h - 2, w - 2), x_nhw.dtype),
        grid_spec=pltpu.PrefetchScalarGridSpec(
            num_scalar_prefetch=0,
            grid=(pl.cdiv(n, tn),),
            # Last-two block dims equal the full array dims, so any (H, W)
            # satisfies the (8, 128) tiling rule.  The trailing partial N
            # block (when tn does not divide n) is padded on read and its
            # out-of-bounds rows are dropped on writeback.
            in_specs=[pl.BlockSpec((tn, h, w), lambda i: (i, 0, 0))],
            out_specs=pl.BlockSpec((tn, h - 2, w - 2), lambda i: (i, 0, 0)),
        ),
        compiler_params=pltpu.CompilerParams(
            dimension_semantics=("parallel",),
            vmem_limit_bytes=_VMEM_LIMIT,
        ),
    )(x_nhw)


# ---------------------------------------------------------------------------
# Path B: H-tiled path for images too large for VMEM.  The input stays in
# HBM (pl.ANY); each step manually DMAs a (th+2)-row halo window into a
# double-buffered VMEM scratch while the previous window is being consumed.
# ---------------------------------------------------------------------------
def _row_tiled_kernel(x_hbm, o_ref, xbuf, sem, *, th, h, q, do_normalize):
    # x_hbm: full (N, H, W) array in HBM.
    # o_ref: (1, th, W-2) blocked output tile for (image i, row block r).
    # xbuf : (2, th+8, W) VMEM scratch (th+2 rows used; padded to 8-row mult).
    i = pl.program_id(0)
    r = pl.program_id(1)
    nr = pl.num_programs(1)
    slot = r % 2

    def window_start(rr):
        # Clamp so the (th+2)-row window never runs past the image; only the
        # last (possibly partial) row block is affected.
        return jnp.minimum(rr * th, h - (th + 2))

    def issue(rr, s_):
        pltpu.make_async_copy(
            x_hbm.at[i, pl.ds(window_start(rr), th + 2), :],
            xbuf.at[s_, pl.ds(0, th + 2), :],
            sem.at[s_]).start()

    @pl.when(r == 0)              # first row block of each image: fetch now
    def _():
        issue(0, 0)

    @pl.when(r + 1 < nr)          # prefetch the next row block of this image
    def _():
        issue(r + 1, 1 - slot)

    pltpu.make_async_copy(
        x_hbm.at[i, pl.ds(window_start(r), th + 2), :],
        xbuf.at[slot, pl.ds(0, th + 2), :],
        sem.at[slot]).wait()

    win = xbuf[slot][:th + 2]                                  # (th+2, W)
    out = _stencil(win, do_normalize).astype(o_ref.dtype)      # (th,  W-2)

    if q == 0:
        o_ref[0, :, :] = out
    else:
        # Last row block is partial: its window start was clamped up by
        # (th - q) rows, so realign; block rows >= q are out of bounds and
        # dropped by the writeback.
        @pl.when(r < nr - 1)
        def _():
            o_ref[0, :, :] = out

        @pl.when(r == nr - 1)
        def _():
            o_ref[0, :q, :] = out[th - q:, :]


def _clamp_th(th, h):
    th = max(8, (th // 8) * 8)                       # output block rows % 8
    return min(th, max(8, ((h - 2) // 8) * 8))       # and <= H-2


def _pick_th(h, w):
    # ~1.5 MiB f32 input window per row block.
    return _clamp_th((3 * 1024 * 1024 // 2) // max(w * 4, 1), h)


def _laplacian_row_tiled(x_nhw, do_normalize, th):
    n, h, w = x_nhw.shape
    th = _clamp_th(th, h)
    assert th + 2 <= h
    nr = pl.cdiv(h - 2, th)
    q = (h - 2) % th
    kernel = functools.partial(_row_tiled_kernel, th=th, h=h, q=q,
                               do_normalize=do_normalize)
    return pl.pallas_call(
        kernel,
        out_shape=jax.ShapeDtypeStruct((n, h - 2, w - 2), x_nhw.dtype),
        grid_spec=pltpu.PrefetchScalarGridSpec(
            num_scalar_prefetch=0,
            grid=(n, nr),
            in_specs=[pl.BlockSpec(memory_space=pl.ANY)],    # stay in HBM
            out_specs=pl.BlockSpec((1, th, w - 2), lambda i, r: (i, r, 0)),
            scratch_shapes=[
                pltpu.VMEM((2, th + 8, w), x_nhw.dtype),     # halo windows
                pltpu.SemaphoreType.DMA((2,)),
            ],
        ),
        compiler_params=pltpu.CompilerParams(
            dimension_semantics=("parallel", "arbitrary"),
            vmem_limit_bytes=_VMEM_LIMIT,
        ),
    )(x_nhw)


# ---------------------------------------------------------------------------
# Dispatcher + public wrapper.
# ---------------------------------------------------------------------------
def _laplacian_nhw(x_nhw, do_normalize, rows_per_block=None):
    n, h, w = x_nhw.shape
    assert h >= 3 and w >= 3, "LaplacianLayer needs spatial dims >= 3"
    if rows_per_block is not None and h - 2 >= 8:
        return _laplacian_row_tiled(x_nhw, do_normalize, rows_per_block)
    tn = _pick_tn(n, h, w, jnp.dtype(x_nhw.dtype).itemsize)
    if tn >= 1:
        return _laplacian_whole(x_nhw, do_normalize, tn)
    if h - 2 >= 8:
        return _laplacian_row_tiled(x_nhw, do_normalize, _pick_th(h, w))
    # Extremely short & wide image: one image per step and hope it fits.
    # TODO(synk): W tiling with a 2-column halo would be needed here.
    return _laplacian_whole(x_nhw, do_normalize, 1)


def laplacian_layer(x, do_normalize=True, rows_per_block=None):
    """Matches LaplacianLayer.forward for 2D, 3D, or 4D inputs."""
    assert x.ndim in (2, 3, 4)
    if not jnp.issubdtype(x.dtype, jnp.floating):
        x = x.astype(jnp.float32)
    if x.ndim == 4:
        b, c, h, w = x.shape
        y = _laplacian_nhw(x.reshape(b * c, h, w), do_normalize, rows_per_block)
        return y.reshape(b, c, h - 2, w - 2)
    if x.ndim == 3:
        return _laplacian_nhw(x, do_normalize, rows_per_block)
    y = _laplacian_nhw(x[None], do_normalize, rows_per_block)
    return y[0]


# ---------------------------------------------------------------------------
# Pure-JAX reference for verification.
# ---------------------------------------------------------------------------
def _reference(x, do_normalize=True):
    x = x.astype(jnp.float32)
    nd = x.ndim
    if nd == 4:
        b, c, h, w = x.shape
        xx = x.reshape(b * c, h, w)
    elif nd == 3:
        xx = x
    else:
        xx = x[None]
    c0 = xx[:, 1:-1, 1:-1]
    up, dn = xx[:, :-2, 1:-1], xx[:, 2:, 1:-1]
    lf, rt = xx[:, 1:-1, :-2], xx[:, 1:-1, 2:]
    nom = jnp.abs(4.0 * c0 - up - dn - lf - rt)
    out = nom / (4.0 * c0 + up + dn + lf + rt) if do_normalize else nom
    if nd == 4:
        return out.reshape(b, c, h - 2, w - 2)
    if nd == 3:
        return out
    return out[0]


if __name__ == "__main__":
    key = jax.random.PRNGKey(0)
    k1, k2, k3 = jax.random.split(key, 3)

    # Primary example: (B, C, H, W) = (2, 4, 16, 16); positive values so the
    # normalizing denominator is well behaved (depth maps in the source repo).
    x4 = jax.random.uniform(k1, (2, 4, 16, 16), jnp.float32, 0.5, 2.0)
    y4 = jax.block_until_ready(laplacian_layer(x4, do_normalize=True))
    assert y4.shape == (2, 4, 14, 14), y4.shape
    assert jnp.allclose(y4, _reference(x4, True), atol=1e-5, rtol=1e-5)

    y4n = jax.block_until_ready(laplacian_layer(x4, do_normalize=False))
    assert jnp.allclose(y4n, _reference(x4, False), atol=1e-5, rtol=1e-5)

    # 3D / 2D paths.
    x3 = x4[0]
    y3 = jax.block_until_ready(laplacian_layer(x3))
    assert y3.shape == (4, 14, 14)
    assert jnp.allclose(y3, _reference(x3, True), atol=1e-5, rtol=1e-5)

    x2 = x4[0, 0]
    y2 = jax.block_until_ready(laplacian_layer(x2))
    assert y2.shape == (14, 14)
    assert jnp.allclose(y2, _reference(x2, True), atol=1e-5, rtol=1e-5)

    # Batch that does not divide the image-block size (exercises the padded
    # read / masked writeback of the partial final N block).
    x5 = jax.random.uniform(k2, (5, 16, 16), jnp.float32, 0.5, 2.0)
    y5 = jax.block_until_ready(laplacian_layer(x5))
    assert jnp.allclose(y5, _reference(x5, True), atol=1e-5, rtol=1e-5)

    # bf16 inputs stay bf16 in HBM (arithmetic in f32 inside the kernel).
    xb = x4.astype(jnp.bfloat16)
    yb = jax.block_until_ready(laplacian_layer(xb))
    assert yb.dtype == jnp.bfloat16
    assert jnp.allclose(yb.astype(jnp.float32),
                        _reference(xb.astype(jnp.float32), True),
                        atol=2e-2, rtol=2e-2)

    # Force the H-tiled (manual halo-DMA) path, including a partial last row
    # block (68 output rows, th=16 -> q=4) and multiple images.
    xr = jax.random.uniform(k3, (3, 70, 256), jnp.float32, 0.5, 2.0)
    yr = jax.block_until_ready(laplacian_layer(xr, rows_per_block=16))
    assert yr.shape == (3, 68, 254)
    assert jnp.allclose(yr, _reference(xr, True), atol=1e-5, rtol=1e-5)

    print("KERNEL_OK")
</pallas_src>

<mosaic_0001>
module attributes {stable_mosaic.version = 11 : i64} {
  func.func @_whole_image_kernel(%arg0: i32, %arg1: memref<2x16x16xf32, #tpu.memory_space<vmem>>, %arg2: memref<2x14x14xf32, #tpu.memory_space<vmem>>) attributes {dimension_semantics = [#tpu.dimension_semantics<parallel>], iteration_bounds = array<i64: 4>, scalar_prefetch = 0 : i64, scratch_operands = 0 : i64, tpu.core_type = #tpu.core_type<tc>, window_params = [{transform_indices = @transform_0, window_bounds = array<i64: 2, 16, 16>}, {transform_indices = @transform_1, window_bounds = array<i64: 2, 14, 14>}]} {
    %c0 = arith.constant 0 : index
    %c0_0 = arith.constant 0 : index
    %c0_1 = arith.constant 0 : index
    %0 = vector.load %arg1[%c0, %c0_0, %c0_1] : memref<2x16x16xf32, #tpu.memory_space<vmem>>, vector<2x16x16xf32>
    %1 = vector.extract_strided_slice %0 {offsets = [0, 1, 1], sizes = [2, 14, 14], strides = [1, 1, 1]} : vector<2x16x16xf32> to vector<2x14x14xf32>
    %2 = vector.extract_strided_slice %0 {offsets = [0, 0, 1], sizes = [2, 14, 14], strides = [1, 1, 1]} : vector<2x16x16xf32> to vector<2x14x14xf32>
    %3 = vector.extract_strided_slice %0 {offsets = [0, 2, 1], sizes = [2, 14, 14], strides = [1, 1, 1]} : vector<2x16x16xf32> to vector<2x14x14xf32>
    %4 = arith.addf %2, %3 : vector<2x14x14xf32>
    %5 = vector.extract_strided_slice %0 {offsets = [0, 1, 0], sizes = [2, 14, 14], strides = [1, 1, 1]} : vector<2x16x16xf32> to vector<2x14x14xf32>
    %6 = arith.addf %4, %5 : vector<2x14x14xf32>
    %7 = vector.extract_strided_slice %0 {offsets = [0, 1, 2], sizes = [2, 14, 14], strides = [1, 1, 1]} : vector<2x16x16xf32> to vector<2x14x14xf32>
    %8 = arith.addf %6, %7 : vector<2x14x14xf32>
    %cst = arith.constant 4.000000e+00 : f32
    %9 = vector.broadcast %cst : f32 to vector<2x14x14xf32>
    %10 = arith.mulf %9, %1 : vector<2x14x14xf32>
    %11 = arith.subf %10, %8 : vector<2x14x14xf32>
    %12 = math.absf %11 : vector<2x14x14xf32>
    %13 = arith.addf %10, %8 : vector<2x14x14xf32>
    %14 = arith.divf %12, %13 : vector<2x14x14xf32>
    %c0_2 = arith.constant 0 : index
    %c0_3 = arith.constant 0 : index
    %c0_4 = arith.constant 0 : index
    %15 = vector.load %arg2[%c0_2, %c0_3, %c0_4] : memref<2x14x14xf32, #tpu.memory_space<vmem>>, vector<2x14x14xf32>
    tpu.vector_store %arg2[%c0_2, %c0_3, %c0_4], %14 {strides = array<i32>} : memref<2x14x14xf32, #tpu.memory_space<vmem>>, vector<2x14x14xf32>,
    return
  }
  func.func @transform_0(%arg0: i32) -> (i32, i32, i32) {
    %c0_i32 = arith.constant 0 : i32
    %c0_i32_0 = arith.constant 0 : i32
    %c0_i32_1 = arith.constant 0 : i32
    return %arg0, %c0_i32, %c0_i32_0 : i32, i32, i32
  }
  func.func @transform_1(%arg0: i32) -> (i32, i32, i32) {
    %c0_i32 = arith.constant 0 : i32
    %c0_i32_0 = arith.constant 0 : i32
    %c0_i32_1 = arith.constant 0 : i32
    return %arg0, %c0_i32, %c0_i32_0 : i32, i32, i32
  }
}

</mosaic_0001>

<bundles_post_ra>
// kernel: tpu_custom_call.1
= control target key start
LH: loop header
LB: loop body
LE: loop exit
PB: predicated region body
PF: predicated region fallthrough
CT: control target
= control target key end

     0   :  { %6 = vsyncpa [#allocation3], 0  ;;  %s603_s0 = inlined_call_operand.hbm [shape: f32[8,16,16], index: 0, kind: input, shape index: {}]   ;;  %s604_s1 = inlined_call_operand.vmem [shape: f32[8,14,14], index: 1, kind: output, shape index: {}]  }
   0x1   :  { %8 = vsyncpa [#allocation3 + $0x1], 0  ;;  %s484_s6 = smov 0   ;;  %s486_s7 = smov 0  }
   0x2   :  { %s488_s8 = smov 0   ;;  %s490_s9 = smov 0  }
   0x3 LB: > { %s334_s10 = sadd.s32 4294967295, %s467_s9   ;;  %s504_s11 = sadd.s32 1, %s467_s9   ;;  %s467_s9 = sphi %s490_s9, %s611_s9   ;;  %s463_s8 = sphi %s488_s8, %s610_s8   ;;  %s459_s7 = sphi %s486_s7, %s609_s7   ;;  %s455_s6 = sphi %s484_s6, %s608_s6  }
   0x4   : > { %s18_s12 = ssub.s32 %s467_s9, %s504_s11  ;;  %s21_s13 = sadd.s32 1, %s463_s8 }
   0x5   : > { %p19_p0 = scmp.eq.s32.totalorder %s18_s12, 0  ;;  %p28_p1 = scmp.ne.s32.totalorder %s463_s8, %s459_s7 }
   0x6   : > { %p29_p2 = scmp.eq.s32.totalorder %s467_s9, 0  ;;  %p34_p3 = scmp.ne.s32.totalorder %s459_s7, %s455_s6 }
   0x7   : > { %s514_s14 = scalar_select %p19_p0, %s463_s8, %s21_s13  }
   0x8   : > { %p30_p4 = por %p29_p2, %p28_p1  ;;  %p35_p5 = scmp.eq.s32.totalorder %s334_s10, 0 }
   0x9   : > { %p358_p6 = scmp.lt.s32.totalorder %s467_s9, 4  ;;  %s84_s16 = sand.u32 1, %s463_s8  }
   0xa   : > { %p519_p7 = por %p35_p5, %p34_p3  ;;  %s338_s17 = sshll.u32 %s84_s16, 5 }
   0xb   : > { %s350_s18 = sshll.u32 %s467_s9, 9  ;;  %s88_s22 = scalar_lea.vmem [#allocation2], %s338_s17 }
   0xc   : > { %s528_s21 = scalar_lea.hbm %s603_s0, %s350_s18  ;;  %s96_s23 = sshll.u32 %s88_s22, 4  ;;  %s530_s23 = int_to_ptr.vmem [resolvable:$true] %s96_s23 }
   0xd   : > { %p532_p8 = pnand %p358_p6, %p30_p4  ;;  %s537_s25 = scalar_lea.sflag [#allocation3], %s84_s16 }
   0xe   : > { %s403_s26 = scalar_lea.hbm %s528_s21, 512  ;;  %s408_s29 = scalar_lea.hbm %s603_s0, 2048 }
   0xf   : > { %p404_p10 = scmp.ne.s32.totalorder %s528_s21, %s403_s26  ;;  %p405_p11 = pneg %p532_p8 }
  0x10   : > { %p409_p0 = scmp.lt.u32.totalorder %s528_s21, %s603_s0  ;;  %p410_p1 = scmp.lt.u32.totalorder %s408_s29, %s403_s26 }
  0x11   : > { %p406_p12 = pnand %p405_p11, %p404_p10  ;;  %p412_p3 = scmp.lt.u32.totalorder %s403_s26, %s528_s21 }
  0x12   : > { %p411_p2 = por %p410_p1, %p409_p0 }
  0x13   : > { %p407_p13 = pneg %p406_p12 }
  0x14   : > { %p413_p4 = por %p412_p3, %p411_p2 }
  0x16   : > { %p414_p5 = pnand %p413_p4, %p407_p13 }
  0x18   : > { %417 = shalt.err (!%p414_p5)
}
  0x19   : > { %s418_s3 = scalar_lea.vmem %s530_s23, 512  ;;  %s469_s4 = smov [#allocation2]  }
  0x1a   : > { %p419_p6 = scmp.ne.s32.totalorder %s530_s23, %s418_s3  ;;  %s423_s5 = sshll.u32 %s469_s4, 4  ;;  %s424_s5 = int_to_ptr.vmem [resolvable:$false] %s423_s5 }
  0x1b   : > { %s425_s6 = scalar_lea.vmem %s424_s5, 1024  ;;  %p426_p9 = scmp.lt.s32.totalorder %s530_s23, %s424_s5 }
  0x1c   : > { %p421_p10 = pnand %p419_p6, %p405_p11  ;;  %p427_p0 = scmp.lt.s32.totalorder %s425_s6, %s418_s3 }
  0x1e   : > { %p422_p12 = pneg %p421_p10  ;;  %p428_p1 = por %p427_p0, %p426_p9 }
  0x20   : > { %p429_p2 = pnand %p428_p1, %p422_p12 }
  0x22   : > { %432 = shalt.err (!%p429_p2)
}
  0x23   : > { %s470_s12 = smov 128   ;;  %s471_s13 = smov 8  }
  0x24   : > { %357 = dma.hbm_to_vmem [thread:$0]  (!%p532_p8), %s528_s21, 512, %s530_s23, %s537_s25, %s470_s12, %s470_s12, %s471_s13  }
  0x25   : > { %p104_p11 = scmp.lt.s32.totalorder %s467_s9, 5  ;;  %p607_p13 = scmp.ge.s32.totalorder %s467_s9, 1 }
  0x27   : > { %p105_p3 = pnand %p607_p13, %p104_p11 }
  0x28   : > { %s110_s16 = sand.u32 (!%p105_p3), 1, %s459_s7  }
  0x29   : > { %108 = sbr.rel (%p105_p3) target bundleno = 316 (0x13c), region = 24  ;;  %s343_s17 = sshll.u32 (!%p105_p3), %s110_s16, 5 }
  0x2a   : > { %s111_s18 = scalar_lea.sflag (!%p105_p3), [#allocation3], %s110_s16  ;;  %s114_s19 = scalar_lea.vmem (!%p105_p3), [#allocation2], %s343_s17 }
  0x30   : > { %450 = dma.done.wait (%p519_p7), %s111_s18, 512  }
  0x31   : > { %452 = vsyncadd (%p519_p7), %s111_s18, 4294966784  ;;  %v145_v0 = vld [vmem:[%s114_s19 + $0x18] sm:$0xff]  ;;  %v143_v1 = vld [vmem:[%s114_s19 + $0x8] sm:$0xff]  ;;  %vm165_vm0 = vcmask 1046528   ;;  %vm150_vm1 = vcmask 1045504   ;;  %s472_s20 = smov 1  }
  0x32   : > { %v142_v2 = vld [vmem:[%s114_s19] sm:$0xff]  ;;  %v170_v3 = vrot.slane %v145_v0, 1  ;;  %v167_v4 = vrot.slane %v143_v1, 1  ;;  %v144_v6 = vld [vmem:[%s114_s19 + $0x10] sm:$0xff]  ;;  %v155_v7 = vrot.slane %v145_v0, 2  ;;  %v152_v8 = vrot.slane %v143_v1, 2 }
  0x33   : > { %v166_v5 = vrot.slane %v142_v2, 1  ;;  %v151_v9 = vrot.slane %v142_v2, 2  ;;  %v154_v10 = vrot.slane %v144_v6, 2  ;;  %v169_v12 = vrot.slane %v144_v6, 1  ;;  %s473_s15 = smov 127   ;;  %s344_s21 = sshll.u32 %s334_s10, 1 }
  0x34   : > { %178 = vrot.lane.b32.xlu1 %v170_v3, %s472_s20  ;;  %174 = vrot.lane.b32.xlu0 %v167_v4, %s472_s20  ;;  %v162_v20 = vadd.f32 %v152_v8, %v143_v1  ;;  %v164_v24 = vadd.f32 %v155_v7, %v145_v0  ;;  %v204_v29 = vmul.f32 4.0, %v142_v2  ;;  %v205_v31 = vmul.f32 4.0, %v143_v1  ;;  %p136_p7 = scmp.lt.s32.totalorder %s344_s21, 7 }
  0x35   : > { %v168_v11 = vsel %vm165_vm0, %v166_v5, %v167_v4  ;;  %v153_v13 = vsel %vm150_vm1, %v151_v9, %v152_v8  ;;  %v156_v14 = vsel %vm150_vm1, %v154_v10, %v155_v7  ;;  %v171_v17 = vsel %vm165_vm0, %v169_v12, %v170_v3 }
  0x36   : > { %v161_v15 = vadd.f32 %v153_v13, %v142_v2  ;;  %v163_v16 = vadd.f32 %v156_v14, %v144_v6  ;;  %vm212_vm2 = vcmask 1040384   ;;  %v206_v43 = vmul.f32 4.0, %v144_v6  ;;  %s613_s21 = smov (!%p136_p7, %s344_s21), 7 }
  0x37   : > { %v207_v47 = vmul.f32 4.0, %v145_v0  ;;  %s351_s22 = sshll.u32 %s613_s21, 4  ;;  %vm259_vm3 = vcmask 113665   ;;  %vm261_vm4 = vcmask 112640  }
  0x38   : > { %190 = vrot.lane.b32.xlu1 %v167_v4, %s473_s15  ;;  %172 = vrot.lane.b32.xlu0 %v168_v11, %s472_s20  ;;  %s140_s25 = scalar_lea.vmem %s604_s1, %s351_s22 }
  0x3c   : > { %176 = vrot.lane.b32.xlu1 %v171_v17, %s472_s20  ;;  %188 = vrot.lane.b32.xlu0 %v168_v11, %s473_s15 }
  0x40   : > { %194 = vrot.lane.b32.xlu1 %v170_v3, %s473_s15  ;;  %192 = vrot.lane.b32.xlu0 %v171_v17, %s473_s15 }
  0xa6   : > { %v179_v18 = vpop.permute.xlu1 %178  ;;  %v175_v19 = vpop.permute.xlu0 %174 }
  0xa7   : > { %v185_v23 = vadd.f32 %v175_v19, %v162_v20  ;;  %v187_v32 = vadd.f32 %v179_v18, %v164_v24 }
  0xaa   : > { %v191_v21 = vpop.permute.xlu1 %190  ;;  %v173_v22 = vpop.permute.xlu0 %172 }
  0xab   : > { %v201_v25 = vadd.f32 %v191_v21, %v185_v23  ;;  %v184_v26 = vadd.f32 %v173_v22, %v161_v15 }
  0xad   : > { %v214_v33 = vrot.slane %v201_v25, 7 }
  0xae   : > { %v177_v27 = vpop.permute.xlu1 %176  ;;  %v189_v28 = vpop.permute.xlu0 %188 }
  0xaf   : > { %v200_v30 = vadd.f32 %v189_v28, %v184_v26  ;;  %v186_v35 = vadd.f32 %v177_v27, %v163_v16 }
  0xb1   : > { %v213_v34 = vrot.slane %v200_v30, 7 }
  0xb2   : > { %v195_v36 = vpop.permute.xlu1 %194  ;;  %v193_v37 = vpop.permute.xlu0 %192 }
  0xb3   : > { %v215_v38 = vsel %vm212_vm2, %v213_v34, %v214_v33  ;;  %v223_v39 = vsub.f32 %v204_v29, %v213_v34  ;;  %v231_v40 = vadd.f32 %v213_v34, %v204_v29  ;;  %v203_v41 = vadd.f32 %v195_v36, %v187_v32 }
  0xb4   : > { %v232_v42 = vadd.f32 %v215_v38, %v205_v31  ;;  %v202_v44 = vadd.f32 %v193_v37, %v186_v35  ;;  %v224_v45 = vsub.f32 %v205_v31, %v215_v38 }
  0xb5   : > { %395 = vrcp.f32 %v231_v40  ;;  %v217_v46 = vrot.slane %v203_v41, 7  ;;  %v227_v54 = vand.u32 2147483647, %v223_v39 }
  0xb6   : > { %397 = vrcp.f32 %v232_v42  ;;  %v216_v48 = vrot.slane %v202_v44, 7  ;;  %v228_v56 = vand.u32 2147483647, %v224_v45 }
  0xb8   : > { %v218_v49 = vsel %vm212_vm2, %v216_v48, %v217_v46  ;;  %v225_v50 = vsub.f32 %v206_v43, %v216_v48  ;;  %v233_v51 = vadd.f32 %v216_v48, %v206_v43 }
  0xb9   : > { %v234_v52 = vadd.f32 %v218_v49, %v207_v47  ;;  %v226_v53 = vsub.f32 %v207_v47, %v218_v49 }
  0xba   : > { %399 = vrcp.f32 %v233_v51  ;;  %v229_v60 = vand.u32 2147483647, %v225_v50 }
  0xbb   : > { %401 = vrcp.f32 %v234_v52  ;;  %v230_v62 = vand.u32 2147483647, %v226_v53 }
  0xbf   : > { %v396_v55 = vpop.eup %395 }
  0xc0   : > { %v398_v57 = vpop.eup %397  ;;  %v236_v58 = vmul.f32 %v396_v55, %v227_v54 }
  0xc1   : > { %v238_v59 = vmul.f32 %v398_v57, %v228_v56 }
  0xc2   : > { %247 = vrot.lane.b32.xlu0 %v236_v58, %s473_s15 }
  0xc3   : > { %249 = vrot.lane.b32.xlu1 %v238_v59, %s473_s15 }
  0xc4   : > { %v400_v61 = vpop.eup %399 }
  0xc5   : > { %v402_v63 = vpop.eup %401  ;;  %v240_v0 = vmul.f32 %v400_v61, %v229_v60 }
  0xc6   : > { %v242_v1 = vmul.f32 %v402_v63, %v230_v62 }
  0xc7   : > { %251 = vrot.lane.b32.xlu0 %v240_v0, %s473_s15 }
  0xc8   : > { %253 = vrot.lane.b32.xlu1 %v242_v1, %s473_s15 }
 0x134   : > { %v248_v2 = vpop.permute.xlu0 %247 }
 0x135   : > { %260 = vst.msk [vmem:[%s140_s25 - $0x1] sm:$0xfe] %vm259_vm3, %v248_v2  ;;  %v250_v3 = vpop.permute.xlu1 %249 }
 0x136   : > { %262 = vst.msk [vmem:[%s140_s25 + $0x7] sm:$0x7f] %vm261_vm4, %v250_v3 }
 0x139   : > { %v252_v4 = vpop.permute.xlu0 %251 }
 0x13a   : > { %263 = vst.msk [vmem:[%s140_s25 + $0xf] sm:$0xfe] %vm259_vm3, %v252_v4  ;;  %v254_v5 = vpop.permute.xlu1 %253 }
 0x13b   : > { %264 = vst.msk [vmem:[%s140_s25 + $0x17] sm:$0x7f] %vm261_vm4, %v254_v5 }
 0x13c PF: > { %p11_p8 = scmp.ge.s32.totalorder %s504_s11, 6   ;;  %s608_s6 = smov %s459_s7 }
 0x13d   : > { %s609_s7 = smov %s463_s8  ;;  %s610_s8 = smov %s514_s14 }
 0x13e   : > { %s611_s9 = smov %s504_s11  ;;  %13 = sbr.rel (!%p11_p8) target bundleno = 3 (0x3), region = 64 }
 0x145   :  { %289 = vsyncpa [#allocation3], 1 }
 0x146   :  { %291 = vsyncpa [#allocation3 + $0x1], 1 }

</bundles_post_ra>
